<compile_context>
chip_gen: v5e
topology: v5e:2x2
jax: 0.10.0
libtpu: 0.0.40
codegen_flags: <defaults>
</compile_context>

<pallas_src>
import functools

import jax
import jax.numpy as jnp
from jax import lax
from jax.experimental import pallas as pl
from jax.experimental.pallas import tpu as pltpu

_MIB = 1024 * 1024


def _round_up(x, m):
    return ((x + m - 1) // m) * m


def _gelu_tanh(x):
    # Matches the PyTorch GELU in the spec verbatim (coefficient 0.44715, NOT the
    # 0.044715 used by torch.nn.GELU(approximate="tanh")).
    dt = x.dtype
    c = jnp.asarray(0.7978845608028654, dt)  # sqrt(2/pi)
    return (jnp.asarray(0.5, dt) * x *
            (jnp.asarray(1.0, dt) +
             jnp.tanh(c * (x + jnp.asarray(0.44715, dt) * (x * x * x)))))


# ---------------------------------------------------------------------------
# Kernel bodies
# ---------------------------------------------------------------------------

def _make_resident_kernel(hc, gelu_dtype, precision):
    """Weights fully VMEM-resident.  hidden is processed in `hc`-wide static chunks so
    the live f32 intermediate + its narrowed copy is (tm, hc) instead of (tm, hidden)."""

    def kernel(x_ref, w1_ref, b1_ref, w2_ref, b2_ref, o_ref):
        x = x_ref[...]                                           # (tm, emb)
        hidden = w1_ref.shape[1]
        acc = None
        # Static unroll with static ref slices (zero-cost views); chunk count is kept
        # small (<= ~8) by the planner so live intermediates stay a few MiB.
        for c0 in range(0, hidden, hc):
            h = jnp.dot(x, w1_ref[:, c0:c0 + hc],                # MXU, f32 accumulate
                        preferred_element_type=jnp.float32, precision=precision)
            h = h + b1_ref[:, c0:c0 + hc].astype(jnp.float32)
            h = _gelu_tanh(h.astype(gelu_dtype)).astype(w2_ref.dtype)
            contrib = jnp.dot(h, w2_ref[c0:c0 + hc, :],
                              preferred_element_type=jnp.float32, precision=precision)
            acc = contrib if acc is None else acc + contrib
        o_ref[...] = (acc + b2_ref[...].astype(jnp.float32)).astype(o_ref.dtype)

    return kernel


def _make_hidden_tiled_kernel(gelu_dtype, precision):
    """Hidden dim tiled on grid axis 1 ("arbitrary"); each hidden tile's contribution
    to the second matmul accumulates into an f32 VMEM scratch, finalized on the last
    step (GELU is elementwise over hidden, so the decomposition is exact)."""

    def kernel(x_ref, w1_ref, b1_ref, w2_ref, b2_ref, o_ref, acc_ref):
        k = pl.program_id(1)

        @pl.when(k == 0)
        def _init():
            acc_ref[...] = jnp.zeros_like(acc_ref)

        h = jnp.dot(x_ref[...], w1_ref[...],
                    preferred_element_type=jnp.float32, precision=precision)
        h = h + b1_ref[...].astype(jnp.float32)
        h = _gelu_tanh(h.astype(gelu_dtype)).astype(w2_ref.dtype)
        acc_ref[...] += jnp.dot(h, w2_ref[...],
                                preferred_element_type=jnp.float32, precision=precision)

        @pl.when(k == pl.num_programs(1) - 1)
        def _finalize():
            o_ref[...] = (acc_ref[...] + b2_ref[...].astype(jnp.float32)).astype(o_ref.dtype)

    return kernel


# ---------------------------------------------------------------------------
# Hardware query + tile planning
# ---------------------------------------------------------------------------

def _hw_info():
    kind = ""
    try:
        kind = jax.devices()[0].device_kind.lower()
    except Exception:
        pass
    vmem_cap = None
    try:
        vmem_cap = int(pltpu.get_tpu_info().vmem_capacity_bytes)
    except Exception:
        pass
    if vmem_cap is None:
        vmem_cap = 64 * _MIB                      # conservative: smallest per-core VMEM
    is_v5 = "v5" in kind
    tight_vmem = vmem_cap <= 64 * _MIB            # v7x-class: 64 MiB/TC, 2 TCs/chip
    # ~112 MiB on v5e/v6e (128 MiB physical), ~52 MiB on v7x (64 MiB physical), always
    # leaving headroom for Mosaic internal scratch and compiler temporaries.
    vmem_limit = max(32 * _MIB, min(vmem_cap - 12 * _MIB, 112 * _MIB))
    return {"kind": kind, "vmem_cap": vmem_cap, "vmem_limit": vmem_limit,
            "is_v5": is_v5, "tight_vmem": tight_vmem, "two_cores": tight_vmem}


def _pick_tm(M, tm, row_align):
    """Prefer a row tile that divides M exactly (no jnp.pad => no extra HBM round-trip
    on the activations); otherwise keep `tm` and pad the tail tile."""
    if M % tm == 0:
        return tm, False
    start = (tm // row_align) * row_align
    lo = max(row_align, tm // 4)
    for cand in range(start, lo - 1, -row_align):
        if cand > 0 and M % cand == 0:
            return cand, False
    return tm, True


def _plan(M, emb, hidden, x_item, w_item, hw, row_align):
    """Pick execution path and tile sizes from a per-generation VMEM budget."""
    budget = int(0.85 * hw["vmem_limit"])         # headroom for compiler temporaries

    # Hidden chunk used inside the resident kernel.
    hc = hidden
    if hidden > 2048:
        for cand in (2048, 1024, 512, 256, 128):
            if hidden % cand == 0:
                hc = cand
                break

    def resident_fits(tm):
        # Weights budgeted double-buffered (worst case if Buffered(1) hints are
        # unavailable on this build); the actual request single-buffers them.
        weights = 2 * w_item * (2 * emb * hidden + hidden + emb)
        io = 2 * tm * emb * (2 * x_item)          # x + out tiles, double-buffered
        acc = 4 * tm * emb                        # f32 accumulator
        inter = tm * hc * (4 + w_item)            # f32 intermediate + narrowed copy
        return weights + io + acc + inter <= budget

    def tiled_fits(tm, th):
        weights = 3 * w_item * (2 * emb * th + th) + emb * w_item  # Buffered(3) W1/W2/b1; b2 x1
        io = 2 * tm * emb * (2 * x_item)
        acc = 4 * tm * emb
        inter = tm * th * (4 + w_item)
        return weights + io + acc + inter <= budget

    def cap_two_cores(target):
        # v7x-class chips have 2 TensorCores: keep >=2 tiles on the "parallel" row axis
        # so dimension_semantics=("parallel", ...) can shard across both.
        if hw["two_cores"] and M >= 2 * row_align:
            target = min(target, max(row_align, (M // 2 // row_align) * row_align))
        return max(row_align, target)

    # ---- resident path: weights DMA'd into VMEM once for the whole call ----
    res_target = cap_two_cores(min(512, _round_up(M, row_align)))
    res_cands = sorted({t for t in (res_target, 384, 256, 128, 64, 32, 16, 8)
                        if row_align <= t <= res_target}, reverse=True)
    res_tm = next((t for t in res_cands if resident_fits(t)), None)
    if res_tm is not None and (res_tm >= 128 or res_tm == res_target):
        return {"path": "resident", "tm": _pick_tm(M, res_tm, row_align)[0],
                "th": hidden, "hc": hc}

    # ---- hidden-tiled path: weights streamed per hidden tile ----
    # v6e needs tm>=1024 to stay MXU-bound while re-streaming weights (ridge ~700
    # flop/byte); v5e (~240) and v7x (~310) are fine at 512.
    tiled_target = 1024 if (not hw["is_v5"] and not hw["tight_vmem"]) else 512
    tiled_target = cap_two_cores(min(tiled_target, _round_up(M, row_align)))
    # Keep th >= 512 on the 256-wide MXUs (v6e/v7x); 128/256 only as a v5e fallback.
    th_cands = [2048, 1024, 512] + ([256, 128] if hw["is_v5"] else [])
    th_cands = [t for t in th_cands if t < hidden and hidden % t == 0]
    tm_shrink = sorted({t for t in (tiled_target, 512, 256, 128)
                        if row_align <= t <= tiled_target}, reverse=True)
    for tm_try in tm_shrink:
        for th_try in th_cands:
            if tiled_fits(tm_try, th_try):
                return {"path": "tiled", "tm": _pick_tm(M, tm_try, row_align)[0],
                        "th": th_try, "hc": hc}

    # ---- last resorts (already shrunk as far as the heuristics allow) ----
    if res_tm is not None:
        return {"path": "resident", "tm": _pick_tm(M, res_tm, row_align)[0],
                "th": hidden, "hc": hc}
    if th_cands:
        return {"path": "tiled", "tm": _pick_tm(M, tm_shrink[-1], row_align)[0],
                "th": th_cands[-1], "hc": hc}
    return {"path": "resident", "tm": _pick_tm(M, res_cands[-1], row_align)[0],
            "th": hidden, "hc": hc}


# ---------------------------------------------------------------------------
# pallas_call builders
# ---------------------------------------------------------------------------

def _bspec(shape, index_map, buffers, use_hints):
    """BlockSpec with an optional pipeline-depth hint; degrades gracefully if this
    jax build does not accept pipeline_mode."""
    if buffers is None or not use_hints:
        return pl.BlockSpec(shape, index_map)
    try:
        return pl.BlockSpec(shape, index_map, pipeline_mode=pl.Buffered(buffers))
    except (TypeError, AttributeError):
        return pl.BlockSpec(shape, index_map)


def _cost(Mp, emb, hidden, x_item, w_item, weight_reads):
    weight_bytes = (emb * hidden + hidden * emb + hidden + emb) * w_item
    return pl.CostEstimate(
        flops=4 * Mp * emb * hidden,
        transcendentals=Mp * hidden,
        bytes_accessed=2 * Mp * emb * x_item + weight_reads * weight_bytes)


def _build_resident(kernel, tm, emb, hidden, Mp, out_dtype, vmem_limit, cost, use_hints):
    grid_spec = pltpu.PrefetchScalarGridSpec(
        num_scalar_prefetch=0,
        grid=(Mp // tm,),
        in_specs=[
            pl.BlockSpec((tm, emb), lambda i: (i, 0)),                 # x row tile
            _bspec((emb, hidden), lambda i: (0, 0), 1, use_hints),     # W1 (grid-invariant)
            _bspec((1, hidden), lambda i: (0, 0), 1, use_hints),       # b1
            _bspec((hidden, emb), lambda i: (0, 0), 1, use_hints),     # W2 (grid-invariant)
            _bspec((1, emb), lambda i: (0, 0), 1, use_hints),          # b2
        ],
        out_specs=pl.BlockSpec((tm, emb), lambda i: (i, 0)),
    )
    return pl.pallas_call(
        kernel,
        out_shape=jax.ShapeDtypeStruct((Mp, emb), out_dtype),
        grid_spec=grid_spec,
        compiler_params=pltpu.CompilerParams(
            dimension_semantics=("parallel",), vmem_limit_bytes=vmem_limit),
        cost_estimate=cost)


def _build_tiled(kernel, tm, th, emb, hidden, Mp, out_dtype, vmem_limit, cost, use_hints):
    num_k = hidden // th
    wbuf = min(3, num_k)                     # 3-deep weight pipeline hides the k->k+1 fetch
    grid_spec = pltpu.PrefetchScalarGridSpec(
        num_scalar_prefetch=0,
        grid=(Mp // tm, num_k),              # reduction (hidden) axis last
        in_specs=[
            pl.BlockSpec((tm, emb), lambda i, k: (i, 0)),              # x row tile
            _bspec((emb, th), lambda i, k: (0, k), wbuf, use_hints),   # W1 column block
            _bspec((1, th), lambda i, k: (0, k), wbuf, use_hints),     # b1 block
            _bspec((th, emb), lambda i, k: (k, 0), wbuf, use_hints),   # W2 row block
            _bspec((1, emb), lambda i, k: (0, 0), 1, use_hints),       # b2 (grid-invariant)
        ],
        out_specs=pl.BlockSpec((tm, emb), lambda i, k: (i, 0)),
        scratch_shapes=[pltpu.VMEM((tm, emb), jnp.float32)],
    )
    return pl.pallas_call(
        kernel,
        out_shape=jax.ShapeDtypeStruct((Mp, emb), out_dtype),
        grid_spec=grid_spec,
        compiler_params=pltpu.CompilerParams(
            dimension_semantics=("parallel", "arbitrary"), vmem_limit_bytes=vmem_limit),
        cost_estimate=cost)


# ---------------------------------------------------------------------------
# Public wrapper
# ---------------------------------------------------------------------------

def feed_forward(x, w1, b1, w2, b2, *, tm=None, th=None, compute_dtype=None,
                 vmem_limit_bytes=None):
    """FeedForward forward pass: GELU(x @ W1 + b1) @ W2 + b2.

    x : (batch, seq, emb)
    w1: (emb, hidden), b1: (hidden,)   -- first Linear (weight stored transposed)
    w2: (hidden, emb), b2: (emb,)      -- second Linear (weight stored transposed)
    compute_dtype: optionally cast the matmul operands (e.g. jnp.bfloat16) for ~2x MXU
      throughput and half the HBM/VMEM traffic.  None (default) preserves the input
      dtype and the module's exact numerics; accumulation is always float32.
    """
    batch, seq, emb = x.shape
    hidden = w1.shape[1]
    assert w1.shape == (emb, hidden) and w2.shape == (hidden, emb)
    assert b1.shape == (hidden,) and b2.shape == (emb,)
    out_dtype = x.dtype
    M = batch * seq

    x2d = x.reshape(M, emb)
    if compute_dtype is not None:
        x2d = x2d.astype(compute_dtype)
        w1 = w1.astype(compute_dtype)
        w2 = w2.astype(compute_dtype)

    hw = _hw_info()
    if vmem_limit_bytes is None:
        vmem_limit_bytes = hw["vmem_limit"]
    else:
        hw = dict(hw, vmem_limit=vmem_limit_bytes)

    x_item = x2d.dtype.itemsize
    w_item = w1.dtype.itemsize
    row_align = {4: 8, 2: 16, 1: 32}.get(x_item, 8)

    plan = _plan(M, emb, hidden, x_item, w_item, hw, row_align)
    if tm is not None:
        plan["tm"] = min(_round_up(max(tm, row_align), row_align), _round_up(M, row_align))
    if th is not None:
        assert hidden % th == 0, "hidden tile must divide hidden"
        plan["th"] = th
        plan["path"] = "tiled" if th < hidden else "resident"

    tm_f, th_f, hc = plan["tm"], plan["th"], plan["hc"]
    Mp = _round_up(M, tm_f)
    if Mp != M:
        # Only for ragged M with no aligned divisor (tiny batches); padded rows compute
        # throwaway values and are sliced off below.
        x2d = jnp.pad(x2d, ((0, Mp - M), (0, 0)))

    b1_2d = b1.reshape(1, hidden)
    b2_2d = b2.reshape(1, emb)

    f32_ops = (x2d.dtype == jnp.float32) and (w1.dtype == jnp.float32)
    precision = lax.Precision.HIGHEST if f32_ops else None      # exact f32 semantics
    # bf16 GELU only where the VPU/EUP support it (v6e/v7x) and operands are bf16.
    gelu_dtype = jnp.bfloat16 if (w2.dtype == jnp.bfloat16 and not hw["is_v5"]) else jnp.float32

    weight_reads = 1 if plan["path"] == "resident" else Mp // tm_f
    cost = _cost(Mp, emb, hidden, x_item, w_item, weight_reads)

    args = (x2d, w1, b1_2d, w2, b2_2d)
    if plan["path"] == "resident":
        kern = _make_resident_kernel(hc, gelu_dtype, precision)
        build = functools.partial(_build_resident, kern, tm_f, emb, hidden, Mp,
                                  out_dtype, vmem_limit_bytes, cost)
    else:
        kern = _make_hidden_tiled_kernel(gelu_dtype, precision)
        build = functools.partial(_build_tiled, kern, tm_f, th_f, emb, hidden, Mp,
                                  out_dtype, vmem_limit_bytes, cost)

    try:
        out = build(True)(*args)
    except Exception:
        # Retry only without the pipeline-depth hints (identical math, default
        # double-buffering -- already covered by the VMEM planner's accounting).
        # Any unrelated error will reproduce here and surface to the caller.
        out = build(False)(*args)

    if Mp != M:
        out = out[:M]
    return out.reshape(batch, seq, emb)


# ---------------------------------------------------------------------------
# Self-test
# ---------------------------------------------------------------------------

def _reference(x2d, w1, b1, w2, b2):
    prec = lax.Precision.HIGHEST
    h = jnp.dot(x2d, w1, precision=prec) + b1
    h = _gelu_tanh(h)
    return jnp.dot(h, w2, precision=prec) + b2


if __name__ == "__main__":
    root = jax.random.PRNGKey(0)

    def check(case_idx, batch, seq, emb, dtype=jnp.float32, **kw):
        hidden = 4 * emb
        kx, kw1, kb1, kw2, kb2 = jax.random.split(jax.random.fold_in(root, case_idx), 5)
        x = jax.random.normal(kx, (batch, seq, emb), dtype=dtype)
        # Deterministic synthetic parameters (not a checkpoint load).
        w1 = (jax.random.normal(kw1, (emb, hidden)) * 0.02).astype(dtype)
        b1 = (jax.random.normal(kb1, (hidden,)) * 0.01).astype(dtype)
        w2 = (jax.random.normal(kw2, (hidden, emb)) * 0.02).astype(dtype)
        b2 = (jax.random.normal(kb2, (emb,)) * 0.01).astype(dtype)

        y = jax.block_until_ready(feed_forward(x, w1, b1, w2, b2, **kw))
        y_ref = _reference(x.reshape(-1, emb).astype(jnp.float32),
                           w1.astype(jnp.float32), b1.astype(jnp.float32),
                           w2.astype(jnp.float32), b2.astype(jnp.float32)
                           ).reshape(batch, seq, emb)
        err = float(jnp.max(jnp.abs(y.astype(jnp.float32) - y_ref)))
        assert err < 2e-4, f"case {case_idx}: max abs err {err}"

    # Toy config consistent with the module: emb_dim=32 -> hidden=128 (resident path).
    check(0, batch=2, seq=8, emb=32)
    # Ragged row count (batch*seq = 15) exercises the padded-tail path.
    check(1, batch=3, seq=5, emb=32)
    # emb=64 -> hidden=256; th=128 forces the hidden-tiled (grid reduction) path.
    check(2, batch=2, seq=8, emb=64, th=128)
    print("KERNEL_OK")
</pallas_src>

<mosaic_0001>
module attributes {stable_mosaic.version = 11 : i64} {
  func.func @kernel(%arg0: i32, %arg1: memref<8x32xf32, #tpu.memory_space<vmem>>, %arg2: memref<32x128xf32, #tpu.memory_space<vmem>>, %arg3: memref<1x128xf32, #tpu.memory_space<vmem>>, %arg4: memref<128x32xf32, #tpu.memory_space<vmem>>, %arg5: memref<1x32xf32, #tpu.memory_space<vmem>>, %arg6: memref<8x32xf32, #tpu.memory_space<vmem>>) attributes {dimension_semantics = [#tpu.dimension_semantics<parallel>], iteration_bounds = array<i64: 2>, scalar_prefetch = 0 : i64, scratch_operands = 0 : i64, tpu.core_type = #tpu.core_type<tc>, window_params = [{transform_indices = @transform_0, window_bounds = array<i64: 8, 32>}, {pipeline_mode = #tpu.pipeline_mode<synchronous>, transform_indices = @transform_1, window_bounds = array<i64: 32, 128>}, {pipeline_mode = #tpu.pipeline_mode<synchronous>, transform_indices = @transform_2, window_bounds = array<i64: 1, 128>}, {pipeline_mode = #tpu.pipeline_mode<synchronous>, transform_indices = @transform_3, window_bounds = array<i64: 128, 32>}, {pipeline_mode = #tpu.pipeline_mode<synchronous>, transform_indices = @transform_4, window_bounds = array<i64: 1, 32>}, {transform_indices = @transform_5, window_bounds = array<i64: 8, 32>}]} {
    %c0 = arith.constant 0 : index
    %c0_0 = arith.constant 0 : index
    %0 = vector.load %arg1[%c0, %c0_0] : memref<8x32xf32, #tpu.memory_space<vmem>>, vector<8x32xf32>
    %c0_1 = arith.constant 0 : index
    %c0_2 = arith.constant 0 : index
    %1 = vector.load %arg2[%c0_1, %c0_2] : memref<32x128xf32, #tpu.memory_space<vmem>>, vector<32x128xf32>
    %cst = arith.constant dense<0.000000e+00> : vector<8x128xf32>
    %2 = tpu.matmul %0, %1, %cst {dimension_numbers = #tpu.dot_dimension_numbers<[1], [0], [0], [1], [0, 0, 1, 1], [], []>, precision = #tpu.contract_precision<fp32>} : vector<8x32xf32>, vector<32x128xf32>, vector<8x128xf32> -> vector<8x128xf32>
    %c0_3 = arith.constant 0 : index
    %c0_4 = arith.constant 0 : index
    %3 = vector.load %arg3[%c0_3, %c0_4] : memref<1x128xf32, #tpu.memory_space<vmem>>, vector<1x128xf32>
    %4 = vector.broadcast %3 : vector<1x128xf32> to vector<8x128xf32>
    %5 = arith.addf %2, %4 : vector<8x128xf32>
    %cst_5 = arith.constant 5.000000e-01 : f32
    %6 = vector.broadcast %cst_5 : f32 to vector<8x128xf32>
    %7 = arith.mulf %6, %5 : vector<8x128xf32>
    %8 = arith.mulf %5, %5 : vector<8x128xf32>
    %9 = arith.mulf %8, %5 : vector<8x128xf32>
    %cst_6 = arith.constant 4.471500e-01 : f32
    %10 = vector.broadcast %cst_6 : f32 to vector<8x128xf32>
    %11 = arith.mulf %10, %9 : vector<8x128xf32>
    %12 = arith.addf %5, %11 : vector<8x128xf32>
    %cst_7 = arith.constant 0.797884583 : f32
    %13 = vector.broadcast %cst_7 : f32 to vector<8x128xf32>
    %14 = arith.mulf %13, %12 : vector<8x128xf32>
    %15 = math.tanh %14 : vector<8x128xf32>
    %cst_8 = arith.constant 1.000000e+00 : f32
    %16 = vector.broadcast %cst_8 : f32 to vector<8x128xf32>
    %17 = arith.addf %16, %15 : vector<8x128xf32>
    %18 = arith.mulf %7, %17 : vector<8x128xf32>
    %c0_9 = arith.constant 0 : index
    %c0_10 = arith.constant 0 : index
    %19 = vector.load %arg4[%c0_9, %c0_10] : memref<128x32xf32, #tpu.memory_space<vmem>>, vector<128x32xf32>
    %cst_11 = arith.constant dense<0.000000e+00> : vector<8x32xf32>
    %20 = tpu.matmul %18, %19, %cst_11 {dimension_numbers = #tpu.dot_dimension_numbers<[1], [0], [0], [1], [0, 0, 1, 1], [], []>, precision = #tpu.contract_precision<fp32>} : vector<8x128xf32>, vector<128x32xf32>, vector<8x32xf32> -> vector<8x32xf32>
    %c0_12 = arith.constant 0 : index
    %c0_13 = arith.constant 0 : index
    %21 = vector.load %arg5[%c0_12, %c0_13] : memref<1x32xf32, #tpu.memory_space<vmem>>, vector<1x32xf32>
    %22 = vector.broadcast %21 : vector<1x32xf32> to vector<8x32xf32>
    %23 = arith.addf %20, %22 : vector<8x32xf32>
    %c0_14 = arith.constant 0 : index
    %c0_15 = arith.constant 0 : index
    %24 = vector.load %arg6[%c0_14, %c0_15] : memref<8x32xf32, #tpu.memory_space<vmem>>, vector<8x32xf32>
    tpu.vector_store %arg6[%c0_14, %c0_15], %23 {strides = array<i32>} : memref<8x32xf32, #tpu.memory_space<vmem>>, vector<8x32xf32>,
    return
  }
  func.func @transform_0(%arg0: i32) -> (i32, i32) {
    %c0_i32 = arith.constant 0 : i32
    %c0_i32_0 = arith.constant 0 : i32
    return %arg0, %c0_i32 : i32, i32
  }
  func.func @transform_1(%arg0: i32) -> (i32, i32) {
    %c0_i32 = arith.constant 0 : i32
    %c0_i32_0 = arith.constant 0 : i32
    %c0_i32_1 = arith.constant 0 : i32
    return %c0_i32, %c0_i32_0 : i32, i32
  }
  func.func @transform_2(%arg0: i32) -> (i32, i32) {
    %c0_i32 = arith.constant 0 : i32
    %c0_i32_0 = arith.constant 0 : i32
    %c0_i32_1 = arith.constant 0 : i32
    return %c0_i32, %c0_i32_0 : i32, i32
  }
  func.func @transform_3(%arg0: i32) -> (i32, i32) {
    %c0_i32 = arith.constant 0 : i32
    %c0_i32_0 = arith.constant 0 : i32
    %c0_i32_1 = arith.constant 0 : i32
    return %c0_i32, %c0_i32_0 : i32, i32
  }
  func.func @transform_4(%arg0: i32) -> (i32, i32) {
    %c0_i32 = arith.constant 0 : i32
    %c0_i32_0 = arith.constant 0 : i32
    %c0_i32_1 = arith.constant 0 : i32
    return %c0_i32, %c0_i32_0 : i32, i32
  }
  func.func @transform_5(%arg0: i32) -> (i32, i32) {
    %c0_i32 = arith.constant 0 : i32
    %c0_i32_0 = arith.constant 0 : i32
    return %arg0, %c0_i32 : i32, i32
  }
}

module attributes {stable_mosaic.version = 11 : i64} {
  func.func @kernel(%arg0: i32, %arg1: memref<8x32xf32, #tpu.memory_space<vmem>>, %arg2: memref<32x128xf32, #tpu.memory_space<vmem>>, %arg3: memref<1x128xf32, #tpu.memory_space<vmem>>, %arg4: memref<128x32xf32, #tpu.memory_space<vmem>>, %arg5: memref<1x32xf32, #tpu.memory_space<vmem>>, %arg6: memref<8x32xf32, #tpu.memory_space<vmem>>) attributes {dimension_semantics = [#tpu.dimension_semantics<parallel>], iteration_bounds = array<i64: 2>, scalar_prefetch = 0 : i64, scratch_operands = 0 : i64, tpu.core_type = #tpu.core_type<tc>, window_params = [{transform_indices = @transform_0, window_bounds = array<i64: 8, 32>}, {pipeline_mode = #tpu.pipeline_mode<synchronous>, transform_indices = @transform_1, window_bounds = array<i64: 32, 128>}, {pipeline_mode = #tpu.pipeline_mode<synchronous>, transform_indices = @transform_2, window_bounds = array<i64: 1, 128>}, {pipeline_mode = #tpu.pipeline_mode<synchronous>, transform_indices = @transform_3, window_bounds = array<i64: 128, 32>}, {pipeline_mode = #tpu.pipeline_mode<synchronous>, transform_indices = @transform_4, window_bounds = array<i64: 1, 32>}, {transform_indices = @transform_5, window_bounds = array<i64: 8, 32>}]} {
    %c0 = arith.constant 0 : index
    %c0_0 = arith.constant 0 : index
    %0 = vector.load %arg1[%c0, %c0_0] : memref<8x32xf32, #tpu.memory_space<vmem>>, vector<8x32xf32>
    %c0_1 = arith.constant 0 : index
    %c0_2 = arith.constant 0 : index
    %1 = vector.load %arg2[%c0_1, %c0_2] : memref<32x128xf32, #tpu.memory_space<vmem>>, vector<32x128xf32>
    %cst = arith.constant dense<0.000000e+00> : vector<8x128xf32>
    %2 = tpu.matmul %0, %1, %cst {dimension_numbers = #tpu.dot_dimension_numbers<[1], [0], [0], [1], [0, 0, 1, 1], [], []>, precision = #tpu.contract_precision<fp32>} : vector<8x32xf32>, vector<32x128xf32>, vector<8x128xf32> -> vector<8x128xf32>
    %c0_3 = arith.constant 0 : index
    %c0_4 = arith.constant 0 : index
    %3 = vector.load %arg3[%c0_3, %c0_4] : memref<1x128xf32, #tpu.memory_space<vmem>>, vector<1x128xf32>
    %4 = vector.broadcast %3 : vector<1x128xf32> to vector<8x128xf32>
    %5 = arith.addf %2, %4 : vector<8x128xf32>
    %cst_5 = arith.constant 5.000000e-01 : f32
    %6 = vector.broadcast %cst_5 : f32 to vector<8x128xf32>
    %7 = arith.mulf %6, %5 : vector<8x128xf32>
    %8 = arith.mulf %5, %5 : vector<8x128xf32>
    %9 = arith.mulf %8, %5 : vector<8x128xf32>
    %cst_6 = arith.constant 4.471500e-01 : f32
    %10 = vector.broadcast %cst_6 : f32 to vector<8x128xf32>
    %11 = arith.mulf %10, %9 : vector<8x128xf32>
    %12 = arith.addf %5, %11 : vector<8x128xf32>
    %cst_7 = arith.constant 0.797884583 : f32
    %13 = vector.broadcast %cst_7 : f32 to vector<8x128xf32>
    %14 = arith.mulf %13, %12 : vector<8x128xf32>
    %15 = math.tanh %14 : vector<8x128xf32>
    %cst_8 = arith.constant 1.000000e+00 : f32
    %16 = vector.broadcast %cst_8 : f32 to vector<8x128xf32>
    %17 = arith.addf %16, %15 : vector<8x128xf32>
    %18 = arith.mulf %7, %17 : vector<8x128xf32>
    %c0_9 = arith.constant 0 : index
    %c0_10 = arith.constant 0 : index
    %19 = vector.load %arg4[%c0_9, %c0_10] : memref<128x32xf32, #tpu.memory_space<vmem>>, vector<128x32xf32>
    %cst_11 = arith.constant dense<0.000000e+00> : vector<8x32xf32>
    %20 = tpu.matmul %18, %19, %cst_11 {dimension_numbers = #tpu.dot_dimension_numbers<[1], [0], [0], [1], [0, 0, 1, 1], [], []>, precision = #tpu.contract_precision<fp32>} : vector<8x128xf32>, vector<128x32xf32>, vector<8x32xf32> -> vector<8x32xf32>
    %c0_12 = arith.constant 0 : index
    %c0_13 = arith.constant 0 : index
    %21 = vector.load %arg5[%c0_12, %c0_13] : memref<1x32xf32, #tpu.memory_space<vmem>>, vector<1x32xf32>
    %22 = vector.broadcast %21 : vector<1x32xf32> to vector<8x32xf32>
    %23 = arith.addf %20, %22 : vector<8x32xf32>
    %c0_14 = arith.constant 0 : index
    %c0_15 = arith.constant 0 : index
    %24 = vector.load %arg6[%c0_14, %c0_15] : memref<8x32xf32, #tpu.memory_space<vmem>>, vector<8x32xf32>
    tpu.vector_store %arg6[%c0_14, %c0_15], %23 {strides = array<i32>} : memref<8x32xf32, #tpu.memory_space<vmem>>, vector<8x32xf32>,
    return
  }
  func.func @transform_0(%arg0: i32) -> (i32, i32) {
    %c0_i32 = arith.constant 0 : i32
    %c0_i32_0 = arith.constant 0 : i32
    return %arg0, %c0_i32 : i32, i32
  }
  func.func @transform_1(%arg0: i32) -> (i32, i32) {
    %c0_i32 = arith.constant 0 : i32
    %c0_i32_0 = arith.constant 0 : i32
    %c0_i32_1 = arith.constant 0 : i32
    return %c0_i32, %c0_i32_0 : i32, i32
  }
  func.func @transform_2(%arg0: i32) -> (i32, i32) {
    %c0_i32 = arith.constant 0 : i32
    %c0_i32_0 = arith.constant 0 : i32
    %c0_i32_1 = arith.constant 0 : i32
    return %c0_i32, %c0_i32_0 : i32, i32
  }
  func.func @transform_3(%arg0: i32) -> (i32, i32) {
    %c0_i32 = arith.constant 0 : i32
    %c0_i32_0 = arith.constant 0 : i32
    %c0_i32_1 = arith.constant 0 : i32
    return %c0_i32, %c0_i32_0 : i32, i32
  }
  func.func @transform_4(%arg0: i32) -> (i32, i32) {
    %c0_i32 = arith.constant 0 : i32
    %c0_i32_0 = arith.constant 0 : i32
    %c0_i32_1 = arith.constant 0 : i32
    return %c0_i32, %c0_i32_0 : i32, i32
  }
  func.func @transform_5(%arg0: i32) -> (i32, i32) {
    %c0_i32 = arith.constant 0 : i32
    %c0_i32_0 = arith.constant 0 : i32
    return %arg0, %c0_i32 : i32, i32
  }
}

</mosaic_0001>

<bundles_post_ra>
// kernel: tpu_custom_call.1
= control target key start
LH: loop header
LB: loop body
LE: loop exit
PB: predicated region body
PF: predicated region fallthrough
CT: control target
= control target key end

     0   :  { %10 = vsyncpa [#allocation3], 0  ;;  %s1440_s0 = inlined_call_operand.vmem [shape: f32[16,32], index: 0, kind: input, shape index: {}]   ;;  %s1441_s1 = inlined_call_operand.vmem [shape: f32[32,128], index: 1, kind: input, shape index: {}]   ;;  %s1442_s2 = inlined_call_operand.vmem [shape: f32[1,128], index: 2, kind: input, shape index: {}]   ;;  %s1443_s3 = inlined_call_operand.vmem [shape: f32[128,32], index: 3, kind: input, shape index: {}]   ;;  %s1444_s4 = inlined_call_operand.vmem [shape: f32[1,32], index: 4, kind: input, shape index: {}]   ;;  %s1445_s5 = inlined_call_operand.hbm [shape: f32[16,32], index: 5, kind: output, shape index: {}]  }
   0x1   :  { %12 = vsyncpa [#allocation3 + $0x1], 0  ;;  %s1011_s18 = smov 0   ;;  %s1013_s19 = smov 0  }
   0x2   :  { %s1015_s20 = smov 0   ;;  %s1017_s21 = smov 0  }
   0x3 LB: > { %s1032_s22 = sadd.s32 4294967295, %s979_s21   ;;  %s864_s23 = sadd.s32 4294967294, %s979_s21   ;;  %s979_s21 = sphi %s1017_s21, %s1451_s21   ;;  %s975_s20 = sphi %s1015_s20, %s1450_s20   ;;  %s971_s19 = sphi %s1013_s19, %s1449_s19   ;;  %s967_s18 = sphi %s1011_s18, %s1448_s18  }
   0x4   : > { %s1036_s24 = sadd.s32 1, %s979_s21   ;;  %s135_s25 = sadd.s32 1, %s975_s20 }
   0x5   : > { %s132_s26 = ssub.s32 %s979_s21, %s1036_s24  ;;  %p145_p0 = scmp.ne.s32.totalorder %s975_s20, %s971_s19 }
   0x6   : > { %p133_p1 = scmp.eq.s32.totalorder %s132_s26, 0  ;;  %p146_p2 = scmp.eq.s32.totalorder %s1032_s22, 1 }
   0x7   : > { %p151_p3 = scmp.ne.s32.totalorder %s971_s19, %s967_s18  ;;  %p152_p4 = scmp.eq.s32.totalorder %s864_s23, 1 }
   0x8   : > { %s1047_s27 = scalar_select %p133_p1, %s975_s20, %s135_s25  }
   0x9   : > { %p1049_p5 = por %p146_p2, %p145_p0  ;;  %p1053_p6 = por %p152_p4, %p151_p3 }
   0xa   : > { %p867_p7 = scmp.ge.s32.totalorder %s979_s21, 1  ;;  %p189_p8 = scmp.lt.s32.totalorder %s979_s21, 3 }
   0xc   : > { %p190_p9 = pnand %p867_p7, %p189_p8 }
   0xd   : > { %p216_p10 = scmp.lt.s32.totalorder (!%p190_p9), %s1032_s22, 1  ;;  %s871_s8 = sshll.u32 (!%p190_p9), %s1032_s22, 3 }
   0xe   : > { %193 = sbr.rel (%p190_p9) target bundleno = 361 (0x169), region = 40  ;;  %s800_s11 = scalar_lea.hbm (!%p190_p9), %s1445_s5, %s871_s8 }
   0xf   : > { %s804_s14 = sshll.u32 (!%p190_p9), %s800_s11, 4  ;;  %s937_s25 = scalar_lea.hbm (!%p190_p9), %s1445_s5, 16  ;;  %s805_s14 = int_to_ptr.hbm [resolvable:$true] %s804_s14 }
  0x10   : > { %s931_s15 = sshra.s32 (!%p190_p9), %s805_s14, 4  ;;  %s932_s15 = int_to_ptr.hbm [resolvable:$true] %s931_s15 }
  0x11   : > { %s933_s16 = scalar_lea.hbm (!%p190_p9), %s932_s15, 8  ;;  %p938_p0 = scmp.lt.s32.totalorder (!%p190_p9), %s932_s15, %s1445_s5 }
  0x12   : > { %p934_p11 = scmp.ne.s32.totalorder (!%p190_p9), %s932_s15, %s933_s16  ;;  %p939_p1 = scmp.lt.s32.totalorder (!%p190_p9), %s937_s25, %s933_s16 }
  0x13   : > { %v224_v0 = vld [vmem:[%s1441_s1 + $0x18] sm:$0xff]  ;;  %v223_v1 = vld [vmem:[%s1441_s1 + $0x10] sm:$0xff]  ;;  %v222_v2 = vld [vmem:[%s1441_s1 + $0x8] sm:$0xff]  ;;  %s217_s13 = scalar_select %p216_p10, %s1032_s22, 1  ;;  %vm229_vm0 = vcmask 261120  }
  0x14   : > { %v1069_v3 = vand.u32 4294901760, %v224_v0  ;;  %v1071_v4 = vand.u32 4294901760, %v223_v1  ;;  %v1073_v5 = vand.u32 4294901760, %v222_v2  ;;  %v221_v6 = vld [vmem:[%s1441_s1] sm:$0xff]  ;;  %v442_v8 = vld [vmem:[%s1443_s3 + $0x78] sm:$0xff]  ;;  %v441_v9 = vld [vmem:[%s1443_s3 + $0x70] sm:$0xff]  ;;  %p935_p12 = pnand %p934_p11, %p1049_p5  ;;  %p940_p2 = por %p939_p1, %p938_p0 }
  0x15   : > { %v1078_v7 = vand.u32 4294901760, %v221_v6  ;;  %v440_v10 = vld [vmem:[%s1443_s3 + $0x68] sm:$0xff]  ;;  %v1100_v14 = vand.u32 4294901760, %v442_v8  ;;  %v439_v15 = vld [vmem:[%s1443_s3 + $0x60] sm:$0xff]  ;;  %s869_s6 = sshll.u32 %s217_s13, 3  ;;  %v1108_v17 = vand.u32 4294901760, %v441_v9 }
  0x16   : > { %246 = vmatpush.msra.mxu0 %v1069_v3  ;;  %v1092_v11 = vsub.f32 %v224_v0, %v1069_v3  ;;  %v1095_v12 = vsub.f32 %v223_v1, %v1071_v4  ;;  %v1098_v13 = vsub.f32 %v222_v2, %v1073_v5  ;;  %v1110_v18 = vand.u32 4294901760, %v440_v10  ;;  %s219_s9 = scalar_lea.vmem %s1440_s0, %s869_s6  ;;  %v438_v36 = vld [vmem:[%s1443_s3 + $0x58] sm:$0xff]  ;;  %v437_v61 = vld [vmem:[%s1443_s3 + $0x50] sm:$0xff]  ;;  %v436_v63 = vld [vmem:[%s1443_s3 + $0x48] sm:$0xff]  ;;  %s213_s6 = sand.u32 1, %s971_s19  }
  0x17   : > { %v1106_v16 = vsub.f32 %v221_v6, %v1078_v7  ;;  %v1112_v19 = vand.u32 4294901760, %v439_v15  ;;  %v1122_v23 = vsub.f32 %v442_v8, %v1100_v14  ;;  %448 = vmatpush.msra.mxu2 %v1100_v14  ;;  %v220_v24 = vld [vmem:[%s219_s9] sm:$0xff]  ;;  %v1127_v26 = vsub.f32 %v441_v9, %v1108_v17  ;;  %v434_v6 = vld [vmem:[%s1443_s3 + $0x38] sm:$0xff]  ;;  %s868_s7 = sshll.u32 %s213_s6, 3  ;;  %s790_s22 = scalar_lea.sflag [#allocation3], %s213_s6 }
  0x18   : > { %248 = vmatpush.msra.mxu0 %v1071_v4  ;;  %v276_v20 = vand.u32 4294901760, %v1092_v11  ;;  %v282_v21 = vand.u32 4294901760, %v1095_v12  ;;  %v288_v22 = vand.u32 4294901760, %v1098_v13  ;;  %v1130_v27 = vsub.f32 %v440_v10, %v1110_v18  ;;  %v435_v2 = vld [vmem:[%s1443_s3 + $0x40] sm:$0xff]  ;;  %s215_s12 = scalar_lea.vmem [#allocation2], %s868_s7  ;;  %p936_p13 = pneg %p935_p12 }
  0x19   : > { %v294_v25 = vand.u32 4294901760, %v1106_v16  ;;  %v1133_v28 = vsub.f32 %v439_v15, %v1112_v19  ;;  %v231_v32 = vsel %vm229_vm0, %v220_v24, 0  ;;  %450 = vmatpush.msra.mxu2 %v1108_v17  ;;  %v490_v34 = vand.u32 4294901760, %v1122_v23  ;;  %s802_s13 = sshll.u32 %s215_s12, 4  ;;  %s803_s13 = int_to_ptr.vmem [resolvable:$true] %s802_s13 }
  0x1a   : > { %v277_v29 = vsub.f32 %v1092_v11, %v276_v20  ;;  %250 = vmatpush.msra.mxu0 %v1073_v5  ;;  %v283_v30 = vsub.f32 %v1095_v12, %v282_v21  ;;  %v289_v31 = vsub.f32 %v1098_v13, %v288_v22  ;;  %v1145_v33 = vand.u32 4294901760, %v231_v32  ;;  %p941_p3 = pnand %p940_p2, %p936_p13 }
  0x1b   : > { %v496_v35 = vand.u32 4294901760, %v1127_v26  ;;  %v295_v39 = vsub.f32 %v1106_v16, %v294_v25  ;;  %v502_v40 = vand.u32 4294901760, %v1130_v27  ;;  %452 = vmatpush.msra.mxu2 %v1110_v18  ;;  %v491_v42 = vsub.f32 %v1122_v23, %v490_v34 }
  0x1c   : > { %v278_v37 = vand.u32 4294901760, %v277_v29  ;;  %v284_v38 = vand.u32 4294901760, %v283_v30  ;;  %252 = vmatpush.msra.mxu0 %v1078_v7  ;;  %v254_v41 = vsub.f32 %v231_v32, %v1145_v33  ;;  %v290_v44 = vand.u32 4294901760, %v289_v31  ;;  %v431_v31 = vld [vmem:[%s1443_s3 + $0x20] sm:$0xff] }
  0x1d   : > { %v497_v43 = vsub.f32 %v1127_v26, %v496_v35  ;;  %v508_v45 = vand.u32 4294901760, %v1133_v28  ;;  %v1167_v46 = vand.u32 4294901760, %v438_v36  ;;  %454 = vmatpush.msra.mxu2 %v1112_v19  ;;  %v492_v48 = vand.u32 4294901760, %v491_v42 }
  0x1e   : > { %317 = vmatpush.msrb.mxu0 %v1092_v11  ;;  %279 = vmatpush.msra.mxu1 %v278_v37  ;;  %v255_v47 = vand.u32 4294901760, %v254_v41  ;;  %v503_v50 = vsub.f32 %v1130_v27, %v502_v40  ;;  %v296_v51 = vand.u32 4294901760, %v295_v39  ;;  %v1217_v62 = vand.u32 4294901760, %v437_v61  ;;  %v433_v11 = vld [vmem:[%s1443_s3 + $0x30] sm:$0xff]  ;;  %v430_v39 = vld [vmem:[%s1443_s3 + $0x18] sm:$0xff] }
  0x1f   : > { %v498_v49 = vand.u32 4294901760, %v497_v43  ;;  %v1175_v52 = vsub.f32 %v438_v36, %v1167_v46  ;;  %456 = vmatpush.msra.mxu2 %v1167_v46  ;;  %493 = vmatpush.msra.mxu3 %v492_v48  ;;  %v509_v54 = vsub.f32 %v1133_v28, %v508_v45  ;;  %v1225_v1 = vand.u32 4294901760, %v436_v63  ;;  %v429_v48 = vld [vmem:[%s1443_s3 + $0x10] sm:$0xff] }
  0x20   : > { %320 = vmatpush.msrb.mxu0 %v1095_v12  ;;  %285 = vmatpush.msra.mxu1 %v284_v38  ;;  %v256_v53 = vsub.f32 %v254_v41, %v255_v47  ;;  %v504_v57 = vand.u32 4294901760, %v503_v50  ;;  %v1223_v0 = vsub.f32 %v437_v61, %v1217_v62  ;;  %v1251_v10 = vand.u32 4294901760, %v434_v6 }
  0x21   : > { %v514_v55 = vand.u32 4294901760, %v1175_v52  ;;  %499 = vmatpush.msra.mxu3 %v498_v49  ;;  %v510_v59 = vand.u32 4294901760, %v509_v54  ;;  %458 = vmatpush.msra.mxu2 %v1217_v62  ;;  %v1295_v37 = vand.u32 4294901760, %v431_v31 }
  0x22   : > { %323 = vmatpush.msrb.mxu0 %v1098_v13  ;;  %291 = vmatpush.msra.mxu1 %v290_v44  ;;  %v257_v56 = vand.u32 4294901760, %v256_v53  ;;  %v1307_v44 = vand.u32 4294901760, %v430_v39  ;;  %v1325_v53 = vand.u32 4294901760, %v429_v48 }
  0x23   : > { %v515_v58 = vsub.f32 %v1175_v52, %v514_v55  ;;  %505 = vmatpush.msra.mxu3 %v504_v57  ;;  %460 = vmatpush.msra.mxu2 %v1225_v1  ;;  %v1305_v43 = vsub.f32 %v431_v31, %v1295_v37 }
  0x24   : > { %326 = vmatpush.msrb.mxu0 %v1106_v16  ;;  %297 = vmatpush.msra.mxu1 %v296_v51  ;;  %v1264_v16 = vsub.f32 %v434_v6, %v1251_v10  ;;  %v1323_v51 = vsub.f32 %v430_v39, %v1307_v44 }
  0x25   : > { %258 = vmatmul.f32.vlgmr.msra.gmra.mxu0 %v257_v56  ;;  %299 = vmatmul.f32.vlgmr.msra.gmra.mxu1 %v1145_v33  ;;  %v516_v60 = vand.u32 4294901760, %v515_v58  ;;  %v556_v50 = vand.u32 4294901760, %v1305_v43  ;;  %v428_v56 = vld [vmem:[%s1443_s3 + $0x8] sm:$0xff] }
  0x26   : > { %346 = vmatpush.msrb.mxu1 %v1069_v3  ;;  %375 = vmatpush.msra.mxu0 %v276_v20  ;;  %v1268_v20 = vand.u32 4294901760, %v433_v11  ;;  %v1341_v61 = vand.u32 4294901760, %v428_v56 }
  0x27   : > { %511 = vmatpush.msra.mxu3 %v510_v59  ;;  %v557_v58 = vsub.f32 %v1305_v43, %v556_v50  ;;  %v562_v59 = vand.u32 4294901760, %v1323_v51 }
  0x28   : > { %348 = vmatpush.msrb.mxu1 %v1071_v4  ;;  %379 = vmatpush.msra.mxu0 %v282_v21  ;;  %v432_v21 = vld [vmem:[%s1443_s3 + $0x28] sm:$0xff]  ;;  %v1282_v30 = vsub.f32 %v433_v11, %v1268_v20 }
  0x29   : > { %517 = vmatpush.msra.mxu3 %v516_v60  ;;  %v1278_v29 = vand.u32 4294901760, %v432_v21  ;;  %v1338_v60 = vsub.f32 %v429_v48, %v1325_v53  ;;  %v563_v6 = vsub.f32 %v1323_v51, %v562_v59 }
  0x2a   : > { %350 = vmatpush.msrb.mxu1 %v1073_v5  ;;  %383 = vmatpush.msra.mxu0 %v288_v22  ;;  %v544_v38 = vand.u32 4294901760, %v1282_v30 }
  0x2b   : > { %v1293_v36 = vsub.f32 %v432_v21, %v1278_v29 }
  0x2c   : > { %352 = vmatpush.msrb.mxu1 %v1078_v7  ;;  %387 = vmatpush.msra.mxu0 %v294_v25  ;;  %v538_v25 = vand.u32 4294901760, %v1264_v16 }
  0x2d   : > { %329 = vmatmul.f32.vlgmr.msrb.gmra.mxu0 %v254_v41  ;;  %356 = vmatmul.f32.vlgmr.msrb.gmra.mxu1 %v255_v47  ;;  %v550_v42 = vand.u32 4294901760, %v1293_v36  ;;  %v545_v47 = vsub.f32 %v1282_v30, %v544_v38 }
  0x2e   : > { %406 = vmatpush.msra.mxu1 %v1069_v3  ;;  %591 = vmatpush.msrb.mxu0 %v1122_v23  ;;  %v520_v3 = vand.u32 4294901760, %v1223_v0 }
  0x2f   : > { %v551_v49 = vsub.f32 %v1293_v36, %v550_v42  ;;  %v546_v54 = vand.u32 4294901760, %v545_v47 }
  0x30   : > { %408 = vmatpush.msra.mxu1 %v1071_v4  ;;  %594 = vmatpush.msrb.mxu0 %v1127_v26  ;;  %v1234_v4 = vsub.f32 %v436_v63, %v1225_v1  ;;  %v427_v63 = vld [vmem:[%s1443_s3] sm:$0xff] }
  0x31   : > { %v552_v57 = vand.u32 4294901760, %v551_v49  ;;  %v1349_v11 = vand.u32 4294901760, %v427_v63 }
  0x32   : > { %410 = vmatpush.msra.mxu1 %v1073_v5  ;;  %597 = vmatpush.msrb.mxu0 %v1130_v27  ;;  %v1236_v5 = vand.u32 4294901760, %v435_v2  ;;  %v526_v8 = vand.u32 4294901760, %v1234_v4 }
  0x34   : > { %412 = vmatpush.msra.mxu1 %v1078_v7  ;;  %600 = vmatpush.msrb.mxu0 %v1133_v28  ;;  %v521_v7 = vsub.f32 %v1223_v0, %v520_v3  ;;  %v1249_v9 = vsub.f32 %v435_v2, %v1236_v5  ;;  %v527_v13 = vsub.f32 %v1234_v4, %v526_v8  ;;  %v558_v2 = vand.u32 4294901760, %v557_v58 }
  0x35   : > { %389 = vmatmul.f32.vlgmr.msra.gmra.mxu0 %v1145_v33  ;;  %414 = vmatmul.f32.vlgmr.msra.gmra.mxu1 %v1145_v33  ;;  %v539_v33 = vsub.f32 %v1264_v16, %v538_v25 }
  0x36   : > { %644 = vmatpush.msrb.mxu1 %v1100_v14  ;;  %603 = vmatpush.msrb.mxu0 %v1175_v52  ;;  %v522_v12 = vand.u32 4294901760, %v521_v7  ;;  %v532_v15 = vand.u32 4294901760, %v1249_v9  ;;  %v528_v22 = vand.u32 4294901760, %v527_v13  ;;  %v568_v7 = vand.u32 4294901760, %v1338_v60 }
  0x37   : > { %462 = vmatpush.msra.mxu2 %v1236_v5  ;;  %v540_v41 = vand.u32 4294901760, %v539_v33  ;;  %v564_v13 = vand.u32 4294901760, %v563_v6 }
  0x38   : > { %646 = vmatpush.msrb.mxu1 %v1108_v17  ;;  %606 = vmatpush.msrb.mxu0 %v1223_v0  ;;  %v533_v24 = vsub.f32 %v1249_v9, %v532_v15  ;;  %v569_v21 = vsub.f32 %v1338_v60, %v568_v7 }
  0x39   : > { %464 = vmatpush.msra.mxu2 %v1251_v10  ;;  %523 = vmatpush.msra.mxu3 %v522_v12  ;;  %v573_v12 = vsub.f32 %v428_v56, %v1341_v61 }
  0x3a   : > { %648 = vmatpush.msrb.mxu1 %v1110_v18  ;;  %609 = vmatpush.msrb.mxu0 %v1234_v4  ;;  %v534_v32 = vand.u32 4294901760, %v533_v24  ;;  %v570_v31 = vand.u32 4294901760, %v569_v21 }
  0x3b   : > { %466 = vmatpush.msra.mxu2 %v1268_v20  ;;  %529 = vmatpush.msra.mxu3 %v528_v22  ;;  %v579_v22 = vsub.f32 %v427_v63, %v1349_v11  ;;  %v574_v24 = vand.u32 4294901760, %v573_v12 }
  0x3c   : > { %650 = vmatpush.msrb.mxu1 %v1112_v19  ;;  %612 = vmatpush.msrb.mxu0 %v1249_v9 }
  0x3d   : > { %468 = vmatpush.msra.mxu2 %v1278_v29  ;;  %535 = vmatpush.msra.mxu3 %v534_v32  ;;  %v580_v32 = vand.u32 4294901760, %v579_v22  ;;  %v575_v33 = vsub.f32 %v573_v12, %v574_v24 }
  0x3e   : > { %652 = vmatpush.msrb.mxu1 %v1167_v46  ;;  %615 = vmatpush.msrb.mxu0 %v1264_v16 }
  0x3f   : > { %470 = vmatpush.msra.mxu2 %v1295_v37  ;;  %541 = vmatpush.msra.mxu3 %v540_v41  ;;  %v581_v39 = vsub.f32 %v579_v22, %v580_v32  ;;  %v576_v41 = vand.u32 4294901760, %v575_v33 }
  0x40   : > { %654 = vmatpush.msrb.mxu1 %v1217_v62  ;;  %618 = vmatpush.msrb.mxu0 %v1282_v30 }
  0x41   : > { %472 = vmatpush.msra.mxu2 %v1307_v44  ;;  %547 = vmatpush.msra.mxu3 %v546_v54  ;;  %v582_v47 = vand.u32 4294901760, %v581_v39 }
  0x42   : > { %656 = vmatpush.msrb.mxu1 %v1225_v1  ;;  %621 = vmatpush.msrb.mxu0 %v1293_v36 }
  0x43   : > { %474 = vmatpush.msra.mxu2 %v1325_v53  ;;  %553 = vmatpush.msra.mxu3 %v552_v57 }
  0x44   : > { %658 = vmatpush.msrb.mxu1 %v1236_v5  ;;  %624 = vmatpush.msrb.mxu0 %v1305_v43 }
  0x45   : > { %476 = vmatpush.msra.mxu2 %v1341_v61  ;;  %559 = vmatpush.msra.mxu3 %v558_v2 }
  0x46   : > { %660 = vmatpush.msrb.mxu1 %v1251_v10  ;;  %627 = vmatpush.msrb.mxu0 %v1323_v51 }
  0x47   : > { %478 = vmatpush.msra.mxu2 %v1349_v11  ;;  %565 = vmatpush.msra.mxu3 %v564_v13 }
  0x48   : > { %662 = vmatpush.msrb.mxu1 %v1268_v20  ;;  %630 = vmatpush.msrb.mxu0 %v1338_v60 }
  0x49   : > { %685 = vmatpush.msrb.mxu2 %v490_v34  ;;  %571 = vmatpush.msra.mxu3 %v570_v31 }
  0x4a   : > { %664 = vmatpush.msrb.mxu1 %v1278_v29  ;;  %633 = vmatpush.msrb.mxu0 %v573_v12 }
  0x4b   : > { %689 = vmatpush.msrb.mxu2 %v496_v35  ;;  %577 = vmatpush.msra.mxu3 %v576_v41 }
  0x4c   : > { %666 = vmatpush.msrb.mxu1 %v1295_v37  ;;  %636 = vmatpush.msrb.mxu0 %v579_v22 }
  0x4d   : > { %693 = vmatpush.msrb.mxu2 %v502_v40  ;;  %583 = vmatpush.msra.mxu3 %v582_v47 }
  0x4e   : > { %668 = vmatpush.msrb.mxu1 %v1307_v44 }
  0x4f   : > { %697 = vmatpush.msrb.mxu2 %v508_v45  ;;  %752 = vmatpush.msrb.mxu3 %v1100_v14 }
  0x50   : > { %670 = vmatpush.msrb.mxu1 %v1325_v53 }
  0x51   : > { %701 = vmatpush.msrb.mxu2 %v514_v55  ;;  %754 = vmatpush.msrb.mxu3 %v1108_v17 }
  0x52   : > { %672 = vmatpush.msrb.mxu1 %v1341_v61 }
  0x53   : > { %705 = vmatpush.msrb.mxu2 %v520_v3  ;;  %756 = vmatpush.msrb.mxu3 %v1110_v18  ;;  %v913_v18 = vld [vmem:[%s1442_s2] ss:$0 sm:$0xff] }
  0x54   : > { %674 = vmatpush.msrb.mxu1 %v1349_v11 }
  0x55   : > { %709 = vmatpush.msrb.mxu2 %v526_v8  ;;  %758 = vmatpush.msrb.mxu3 %v1112_v19 }
  0x57   : > { %713 = vmatpush.msrb.mxu2 %v532_v15  ;;  %760 = vmatpush.msrb.mxu3 %v1167_v46 }
  0x59   : > { %717 = vmatpush.msrb.mxu2 %v538_v25  ;;  %762 = vmatpush.msrb.mxu3 %v1217_v62  ;;  %v914_v25 = vld [vmem:[%s1444_s4] ss:$0 sm:$0xff] }
  0x5b   : > { %721 = vmatpush.msrb.mxu2 %v544_v38  ;;  %764 = vmatpush.msrb.mxu3 %v1225_v1 }
  0x5d   : > { %725 = vmatpush.msrb.mxu2 %v550_v42  ;;  %766 = vmatpush.msrb.mxu3 %v1236_v5 }
  0x5f   : > { %729 = vmatpush.msrb.mxu2 %v556_v50  ;;  %768 = vmatpush.msrb.mxu3 %v1251_v10 }
  0x61   : > { %733 = vmatpush.msrb.mxu2 %v562_v59  ;;  %770 = vmatpush.msrb.mxu3 %v1268_v20 }
  0x63   : > { %737 = vmatpush.msrb.mxu2 %v568_v7  ;;  %772 = vmatpush.msrb.mxu3 %v1278_v29 }
  0x65   : > { %741 = vmatpush.msrb.mxu2 %v574_v24  ;;  %774 = vmatpush.msrb.mxu3 %v1295_v37 }
  0x67   : > { %745 = vmatpush.msrb.mxu2 %v580_v32  ;;  %776 = vmatpush.msrb.mxu3 %v1307_v44 }
  0x69   : > { %778 = vmatpush.msrb.mxu3 %v1325_v53 }
  0x6b   : > { %780 = vmatpush.msrb.mxu3 %v1341_v61 }
  0x6d   : > { %782 = vmatpush.msrb.mxu3 %v1349_v11 }
  0xa2   : > { %v259_v14 = vpop.f32.mrf.mxu0  ;;  %v300_v17 = vpop.f32.mrf.mxu1 }
  0xa3   : > { %v260_v19 = vadd.f32 %v913_v18, %v259_v14 }
  0xa5   : > { %v301_v27 = vadd.f32 %v300_v17, %v260_v19 }
  0xaa   : > { %v330_v23 = vpop.f32.mrf.mxu0  ;;  %v357_v26 = vpop.f32.mrf.mxu1 }
  0xab   : > { %v331_v28 = vadd.f32 %v330_v23, %v301_v27 }
  0xad   : > { %v358_v34 = vadd.f32 %v357_v26, %v331_v28 }
  0xb2   : > { %v390_v35 = vpop.f32.mrf.mxu0  ;;  %v415_v40 = vpop.f32.mrf.mxu1 }
  0xb3   : > { %v391_v45 = vadd.f32 %v390_v35, %v358_v34 }
  0xb5   : > { %v416_v46 = vadd.f32 %v415_v40, %v391_v45 }
  0xb7   : > { %v419_v52 = vmul.f32 %v416_v46, %v416_v46  ;;  %v418_v4 = vmul.f32 0.5, %v416_v46 }
  0xb9   : > { %v420_v55 = vmul.f32 %v419_v52, %v416_v46 }
  0xbb   : > { %v421_v62 = vmul.f32 0.44715, %v420_v55 }
  0xbd   : > { %v422_v0 = vadd.f32 %v421_v62, %v416_v46 }
  0xbf   : > { %v423_v1 = vmul.f32 0.7978846, %v422_v0 }
  0xc1   : > { %915 = vtanh.f32 %v423_v1 }
  0xc7   : > { %v916_v3 = vpop.eup %915 }
  0xc8   : > { %v425_v5 = vadd.f32 1.0, %v916_v3 }
  0xca   : > { %v426_v8 = vmul.f32 %v425_v5, %v418_v4 }
  0xcc   : > { %v479_v9 = vand.u32 4294901760, %v426_v8 }
  0xce   : > { %585 = vmatmul.f32.vlgmr.msra.gmra.mxu3 %v479_v9  ;;  %v480_v10 = vsub.f32 %v426_v8, %v479_v9 }
  0xd0   : > { %639 = vmatmul.f32.vlgmr.msrb.gmra.mxu0 %v480_v10  ;;  %v481_v15 = vand.u32 4294901760, %v480_v10 }
  0xd2   : > { %678 = vmatmul.f32.vlgmr.msrb.gmra.mxu1 %v481_v15  ;;  %v482_v16 = vsub.f32 %v480_v10, %v481_v15 }
  0xd4   : > { %v483_v20 = vand.u32 4294901760, %v482_v16 }
  0xd6   : > { %484 = vmatmul.f32.vlgmr.msra.gmra.mxu2 %v483_v20  ;;  %784 = vmatmul.f32.vlgmr.msrb.gmra.mxu3 %v479_v9 }
  0xde   : > { %747 = vmatmul.f32.vlgmr.msrb.gmra.mxu2 %v479_v9 }
 0x14d   : > { %v640_v38 = vpop.f32.mrf.mxu0 }
 0x14f   : > { %v679_v43 = vpop.f32.mrf.mxu1 }
 0x151   : > { %v586_v29 = vpop.f32.mrf.mxu3 }
 0x159   : > { %v485_v30 = vpop.f32.mrf.mxu2  ;;  %v785_v50 = vpop.f32.mrf.mxu3 }
 0x15a   : > { %v486_v36 = vadd.f32 %v914_v25, %v485_v30 }
 0x15c   : > { %v587_v37 = vadd.f32 %v586_v29, %v486_v36 }
 0x15e   : > { %v641_v42 = vadd.f32 %v640_v38, %v587_v37 }
 0x160   : > { %v680_v44 = vadd.f32 %v679_v43, %v641_v42 }
 0x161   : > { %v748_v48 = vpop.f32.mrf.mxu2 }
 0x162   : > { %v749_v49 = vadd.f32 %v748_v48, %v680_v44 }
 0x164   : > { %v786_v51 = vadd.f32 %v785_v50, %v749_v49 }
 0x166   : > { %788 = vst.msk [vmem:[%s215_s12] sm:$0xff] %vm229_vm0, %v786_v51 }
 0x167   : > { %944 = shalt.err (!%p941_p3)
}
 0x168   : > { %874 = dma.vmem_to_hbm [thread:$0]  (%p1049_p5), %s803_s13, 128, %s805_s14, %s790_s22  }
 0x169 PF: > { %p880_p4 = scmp.ge.s32.totalorder %s979_s21, 2  ;;  %s816_s6 = sand.u32 1, %s967_s18  }
 0x16a   : > { %s817_s7 = scalar_lea.sflag [#allocation3], %s816_s6 }
 0x16b   : > { %p877_p7 = pnand %p880_p4, %p1053_p6 }
 0x16d   : > { %p878_p8 = pneg %p877_p7 }
 0x16f   : > { %962 = dma.done.wait (%p878_p8), %s817_s7, 128  }
 0x170   : > { %964 = vsyncadd (%p878_p8), %s817_s7, 4294967168  ;;  %p15_p9 = scmp.ge.s32.totalorder %s1036_s24, 4   ;;  %s1448_s18 = smov %s971_s19 }
 0x171   : > { %s1449_s19 = smov %s975_s20  ;;  %s1450_s20 = smov %s1047_s27 }
 0x172   : > { %s1451_s21 = smov %s1036_s24  ;;  %17 = sbr.rel (!%p15_p9) target bundleno = 3 (0x3), region = 75 }
 0x177   :  { %823 = vsyncpa [#allocation3], 1 }
 0x178   :  { %825 = vsyncpa [#allocation3 + $0x1], 1 }

// kernel: tpu_custom_call.1
= control target key start
LH: loop header
LB: loop body
LE: loop exit
PB: predicated region body
PF: predicated region fallthrough
CT: control target
= control target key end

     0   :  { %10 = vsyncpa [#allocation3], 0  ;;  %s1440_s0 = inlined_call_operand.vmem [shape: f32[16,32], index: 0, kind: input, shape index: {}]   ;;  %s1441_s1 = inlined_call_operand.vmem [shape: f32[32,128], index: 1, kind: input, shape index: {}]   ;;  %s1442_s2 = inlined_call_operand.vmem [shape: f32[1,128], index: 2, kind: input, shape index: {}]   ;;  %s1443_s3 = inlined_call_operand.vmem [shape: f32[128,32], index: 3, kind: input, shape index: {}]   ;;  %s1444_s4 = inlined_call_operand.vmem [shape: f32[1,32], index: 4, kind: input, shape index: {}]   ;;  %s1445_s5 = inlined_call_operand.hbm [shape: f32[16,32], index: 5, kind: output, shape index: {}]  }
   0x1   :  { %12 = vsyncpa [#allocation3 + $0x1], 0  ;;  %s1011_s18 = smov 0   ;;  %s1013_s19 = smov 0  }
   0x2   :  { %s1015_s20 = smov 0   ;;  %s1017_s21 = smov 0  }
   0x3 LB: > { %s1032_s22 = sadd.s32 4294967295, %s979_s21   ;;  %s864_s23 = sadd.s32 4294967294, %s979_s21   ;;  %s979_s21 = sphi %s1017_s21, %s1451_s21   ;;  %s975_s20 = sphi %s1015_s20, %s1450_s20   ;;  %s971_s19 = sphi %s1013_s19, %s1449_s19   ;;  %s967_s18 = sphi %s1011_s18, %s1448_s18  }
   0x4   : > { %s1036_s24 = sadd.s32 1, %s979_s21   ;;  %s135_s25 = sadd.s32 1, %s975_s20 }
   0x5   : > { %s132_s26 = ssub.s32 %s979_s21, %s1036_s24  ;;  %p145_p0 = scmp.ne.s32.totalorder %s975_s20, %s971_s19 }
   0x6   : > { %p133_p1 = scmp.eq.s32.totalorder %s132_s26, 0  ;;  %p146_p2 = scmp.eq.s32.totalorder %s1032_s22, 1 }
   0x7   : > { %p151_p3 = scmp.ne.s32.totalorder %s971_s19, %s967_s18  ;;  %p152_p4 = scmp.eq.s32.totalorder %s864_s23, 1 }
   0x8   : > { %s1047_s27 = scalar_select %p133_p1, %s975_s20, %s135_s25  }
   0x9   : > { %p1049_p5 = por %p146_p2, %p145_p0  ;;  %p1053_p6 = por %p152_p4, %p151_p3 }
   0xa   : > { %p867_p7 = scmp.ge.s32.totalorder %s979_s21, 1  ;;  %p189_p8 = scmp.lt.s32.totalorder %s979_s21, 3 }
   0xc   : > { %p190_p9 = pnand %p867_p7, %p189_p8 }
   0xd   : > { %p216_p10 = scmp.lt.s32.totalorder (!%p190_p9), %s1032_s22, 1  ;;  %s871_s8 = sshll.u32 (!%p190_p9), %s1032_s22, 3 }
   0xe   : > { %193 = sbr.rel (%p190_p9) target bundleno = 361 (0x169), region = 40  ;;  %s800_s11 = scalar_lea.hbm (!%p190_p9), %s1445_s5, %s871_s8 }
   0xf   : > { %s804_s14 = sshll.u32 (!%p190_p9), %s800_s11, 4  ;;  %s937_s25 = scalar_lea.hbm (!%p190_p9), %s1445_s5, 16  ;;  %s805_s14 = int_to_ptr.hbm [resolvable:$true] %s804_s14 }
  0x10   : > { %s931_s15 = sshra.s32 (!%p190_p9), %s805_s14, 4  ;;  %s932_s15 = int_to_ptr.hbm [resolvable:$true] %s931_s15 }
  0x11   : > { %s933_s16 = scalar_lea.hbm (!%p190_p9), %s932_s15, 8  ;;  %p938_p0 = scmp.lt.s32.totalorder (!%p190_p9), %s932_s15, %s1445_s5 }
  0x12   : > { %p934_p11 = scmp.ne.s32.totalorder (!%p190_p9), %s932_s15, %s933_s16  ;;  %p939_p1 = scmp.lt.s32.totalorder (!%p190_p9), %s937_s25, %s933_s16 }
  0x13   : > { %v224_v0 = vld [vmem:[%s1441_s1 + $0x18] sm:$0xff]  ;;  %v223_v1 = vld [vmem:[%s1441_s1 + $0x10] sm:$0xff]  ;;  %v222_v2 = vld [vmem:[%s1441_s1 + $0x8] sm:$0xff]  ;;  %s217_s13 = scalar_select %p216_p10, %s1032_s22, 1  ;;  %vm229_vm0 = vcmask 261120  }
  0x14   : > { %v1069_v3 = vand.u32 4294901760, %v224_v0  ;;  %v1071_v4 = vand.u32 4294901760, %v223_v1  ;;  %v1073_v5 = vand.u32 4294901760, %v222_v2  ;;  %v221_v6 = vld [vmem:[%s1441_s1] sm:$0xff]  ;;  %v442_v8 = vld [vmem:[%s1443_s3 + $0x78] sm:$0xff]  ;;  %v441_v9 = vld [vmem:[%s1443_s3 + $0x70] sm:$0xff]  ;;  %p935_p12 = pnand %p934_p11, %p1049_p5  ;;  %p940_p2 = por %p939_p1, %p938_p0 }
  0x15   : > { %v1078_v7 = vand.u32 4294901760, %v221_v6  ;;  %v440_v10 = vld [vmem:[%s1443_s3 + $0x68] sm:$0xff]  ;;  %v1100_v14 = vand.u32 4294901760, %v442_v8  ;;  %v439_v15 = vld [vmem:[%s1443_s3 + $0x60] sm:$0xff]  ;;  %s869_s6 = sshll.u32 %s217_s13, 3  ;;  %v1108_v17 = vand.u32 4294901760, %v441_v9 }
  0x16   : > { %246 = vmatpush.msra.mxu0 %v1069_v3  ;;  %v1092_v11 = vsub.f32 %v224_v0, %v1069_v3  ;;  %v1095_v12 = vsub.f32 %v223_v1, %v1071_v4  ;;  %v1098_v13 = vsub.f32 %v222_v2, %v1073_v5  ;;  %v1110_v18 = vand.u32 4294901760, %v440_v10  ;;  %s219_s9 = scalar_lea.vmem %s1440_s0, %s869_s6  ;;  %v438_v36 = vld [vmem:[%s1443_s3 + $0x58] sm:$0xff]  ;;  %v437_v61 = vld [vmem:[%s1443_s3 + $0x50] sm:$0xff]  ;;  %v436_v63 = vld [vmem:[%s1443_s3 + $0x48] sm:$0xff]  ;;  %s213_s6 = sand.u32 1, %s971_s19  }
  0x17   : > { %v1106_v16 = vsub.f32 %v221_v6, %v1078_v7  ;;  %v1112_v19 = vand.u32 4294901760, %v439_v15  ;;  %v1122_v23 = vsub.f32 %v442_v8, %v1100_v14  ;;  %448 = vmatpush.msra.mxu2 %v1100_v14  ;;  %v220_v24 = vld [vmem:[%s219_s9] sm:$0xff]  ;;  %v1127_v26 = vsub.f32 %v441_v9, %v1108_v17  ;;  %v434_v6 = vld [vmem:[%s1443_s3 + $0x38] sm:$0xff]  ;;  %s868_s7 = sshll.u32 %s213_s6, 3  ;;  %s790_s22 = scalar_lea.sflag [#allocation3], %s213_s6 }
  0x18   : > { %248 = vmatpush.msra.mxu0 %v1071_v4  ;;  %v276_v20 = vand.u32 4294901760, %v1092_v11  ;;  %v282_v21 = vand.u32 4294901760, %v1095_v12  ;;  %v288_v22 = vand.u32 4294901760, %v1098_v13  ;;  %v1130_v27 = vsub.f32 %v440_v10, %v1110_v18  ;;  %v435_v2 = vld [vmem:[%s1443_s3 + $0x40] sm:$0xff]  ;;  %s215_s12 = scalar_lea.vmem [#allocation2], %s868_s7  ;;  %p936_p13 = pneg %p935_p12 }
  0x19   : > { %v294_v25 = vand.u32 4294901760, %v1106_v16  ;;  %v1133_v28 = vsub.f32 %v439_v15, %v1112_v19  ;;  %v231_v32 = vsel %vm229_vm0, %v220_v24, 0  ;;  %450 = vmatpush.msra.mxu2 %v1108_v17  ;;  %v490_v34 = vand.u32 4294901760, %v1122_v23  ;;  %s802_s13 = sshll.u32 %s215_s12, 4  ;;  %s803_s13 = int_to_ptr.vmem [resolvable:$true] %s802_s13 }
  0x1a   : > { %v277_v29 = vsub.f32 %v1092_v11, %v276_v20  ;;  %250 = vmatpush.msra.mxu0 %v1073_v5  ;;  %v283_v30 = vsub.f32 %v1095_v12, %v282_v21  ;;  %v289_v31 = vsub.f32 %v1098_v13, %v288_v22  ;;  %v1145_v33 = vand.u32 4294901760, %v231_v32  ;;  %p941_p3 = pnand %p940_p2, %p936_p13 }
  0x1b   : > { %v496_v35 = vand.u32 4294901760, %v1127_v26  ;;  %v295_v39 = vsub.f32 %v1106_v16, %v294_v25  ;;  %v502_v40 = vand.u32 4294901760, %v1130_v27  ;;  %452 = vmatpush.msra.mxu2 %v1110_v18  ;;  %v491_v42 = vsub.f32 %v1122_v23, %v490_v34 }
  0x1c   : > { %v278_v37 = vand.u32 4294901760, %v277_v29  ;;  %v284_v38 = vand.u32 4294901760, %v283_v30  ;;  %252 = vmatpush.msra.mxu0 %v1078_v7  ;;  %v254_v41 = vsub.f32 %v231_v32, %v1145_v33  ;;  %v290_v44 = vand.u32 4294901760, %v289_v31  ;;  %v431_v31 = vld [vmem:[%s1443_s3 + $0x20] sm:$0xff] }
  0x1d   : > { %v497_v43 = vsub.f32 %v1127_v26, %v496_v35  ;;  %v508_v45 = vand.u32 4294901760, %v1133_v28  ;;  %v1167_v46 = vand.u32 4294901760, %v438_v36  ;;  %454 = vmatpush.msra.mxu2 %v1112_v19  ;;  %v492_v48 = vand.u32 4294901760, %v491_v42 }
  0x1e   : > { %317 = vmatpush.msrb.mxu0 %v1092_v11  ;;  %279 = vmatpush.msra.mxu1 %v278_v37  ;;  %v255_v47 = vand.u32 4294901760, %v254_v41  ;;  %v503_v50 = vsub.f32 %v1130_v27, %v502_v40  ;;  %v296_v51 = vand.u32 4294901760, %v295_v39  ;;  %v1217_v62 = vand.u32 4294901760, %v437_v61  ;;  %v433_v11 = vld [vmem:[%s1443_s3 + $0x30] sm:$0xff]  ;;  %v430_v39 = vld [vmem:[%s1443_s3 + $0x18] sm:$0xff] }
  0x1f   : > { %v498_v49 = vand.u32 4294901760, %v497_v43  ;;  %v1175_v52 = vsub.f32 %v438_v36, %v1167_v46  ;;  %456 = vmatpush.msra.mxu2 %v1167_v46  ;;  %493 = vmatpush.msra.mxu3 %v492_v48  ;;  %v509_v54 = vsub.f32 %v1133_v28, %v508_v45  ;;  %v1225_v1 = vand.u32 4294901760, %v436_v63  ;;  %v429_v48 = vld [vmem:[%s1443_s3 + $0x10] sm:$0xff] }
  0x20   : > { %320 = vmatpush.msrb.mxu0 %v1095_v12  ;;  %285 = vmatpush.msra.mxu1 %v284_v38  ;;  %v256_v53 = vsub.f32 %v254_v41, %v255_v47  ;;  %v504_v57 = vand.u32 4294901760, %v503_v50  ;;  %v1223_v0 = vsub.f32 %v437_v61, %v1217_v62  ;;  %v1251_v10 = vand.u32 4294901760, %v434_v6 }
  0x21   : > { %v514_v55 = vand.u32 4294901760, %v1175_v52  ;;  %499 = vmatpush.msra.mxu3 %v498_v49  ;;  %v510_v59 = vand.u32 4294901760, %v509_v54  ;;  %458 = vmatpush.msra.mxu2 %v1217_v62  ;;  %v1295_v37 = vand.u32 4294901760, %v431_v31 }
  0x22   : > { %323 = vmatpush.msrb.mxu0 %v1098_v13  ;;  %291 = vmatpush.msra.mxu1 %v290_v44  ;;  %v257_v56 = vand.u32 4294901760, %v256_v53  ;;  %v1307_v44 = vand.u32 4294901760, %v430_v39  ;;  %v1325_v53 = vand.u32 4294901760, %v429_v48 }
  0x23   : > { %v515_v58 = vsub.f32 %v1175_v52, %v514_v55  ;;  %505 = vmatpush.msra.mxu3 %v504_v57  ;;  %460 = vmatpush.msra.mxu2 %v1225_v1  ;;  %v1305_v43 = vsub.f32 %v431_v31, %v1295_v37 }
  0x24   : > { %326 = vmatpush.msrb.mxu0 %v1106_v16  ;;  %297 = vmatpush.msra.mxu1 %v296_v51  ;;  %v1264_v16 = vsub.f32 %v434_v6, %v1251_v10  ;;  %v1323_v51 = vsub.f32 %v430_v39, %v1307_v44 }
  0x25   : > { %258 = vmatmul.f32.vlgmr.msra.gmra.mxu0 %v257_v56  ;;  %299 = vmatmul.f32.vlgmr.msra.gmra.mxu1 %v1145_v33  ;;  %v516_v60 = vand.u32 4294901760, %v515_v58  ;;  %v556_v50 = vand.u32 4294901760, %v1305_v43  ;;  %v428_v56 = vld [vmem:[%s1443_s3 + $0x8] sm:$0xff] }
  0x26   : > { %346 = vmatpush.msrb.mxu1 %v1069_v3  ;;  %375 = vmatpush.msra.mxu0 %v276_v20  ;;  %v1268_v20 = vand.u32 4294901760, %v433_v11  ;;  %v1341_v61 = vand.u32 4294901760, %v428_v56 }
  0x27   : > { %511 = vmatpush.msra.mxu3 %v510_v59  ;;  %v557_v58 = vsub.f32 %v1305_v43, %v556_v50  ;;  %v562_v59 = vand.u32 4294901760, %v1323_v51 }
  0x28   : > { %348 = vmatpush.msrb.mxu1 %v1071_v4  ;;  %379 = vmatpush.msra.mxu0 %v282_v21  ;;  %v432_v21 = vld [vmem:[%s1443_s3 + $0x28] sm:$0xff]  ;;  %v1282_v30 = vsub.f32 %v433_v11, %v1268_v20 }
  0x29   : > { %517 = vmatpush.msra.mxu3 %v516_v60  ;;  %v1278_v29 = vand.u32 4294901760, %v432_v21  ;;  %v1338_v60 = vsub.f32 %v429_v48, %v1325_v53  ;;  %v563_v6 = vsub.f32 %v1323_v51, %v562_v59 }
  0x2a   : > { %350 = vmatpush.msrb.mxu1 %v1073_v5  ;;  %383 = vmatpush.msra.mxu0 %v288_v22  ;;  %v544_v38 = vand.u32 4294901760, %v1282_v30 }
  0x2b   : > { %v1293_v36 = vsub.f32 %v432_v21, %v1278_v29 }
  0x2c   : > { %352 = vmatpush.msrb.mxu1 %v1078_v7  ;;  %387 = vmatpush.msra.mxu0 %v294_v25  ;;  %v538_v25 = vand.u32 4294901760, %v1264_v16 }
  0x2d   : > { %329 = vmatmul.f32.vlgmr.msrb.gmra.mxu0 %v254_v41  ;;  %356 = vmatmul.f32.vlgmr.msrb.gmra.mxu1 %v255_v47  ;;  %v550_v42 = vand.u32 4294901760, %v1293_v36  ;;  %v545_v47 = vsub.f32 %v1282_v30, %v544_v38 }
  0x2e   : > { %406 = vmatpush.msra.mxu1 %v1069_v3  ;;  %591 = vmatpush.msrb.mxu0 %v1122_v23  ;;  %v520_v3 = vand.u32 4294901760, %v1223_v0 }
  0x2f   : > { %v551_v49 = vsub.f32 %v1293_v36, %v550_v42  ;;  %v546_v54 = vand.u32 4294901760, %v545_v47 }
  0x30   : > { %408 = vmatpush.msra.mxu1 %v1071_v4  ;;  %594 = vmatpush.msrb.mxu0 %v1127_v26  ;;  %v1234_v4 = vsub.f32 %v436_v63, %v1225_v1  ;;  %v427_v63 = vld [vmem:[%s1443_s3] sm:$0xff] }
  0x31   : > { %v552_v57 = vand.u32 4294901760, %v551_v49  ;;  %v1349_v11 = vand.u32 4294901760, %v427_v63 }
  0x32   : > { %410 = vmatpush.msra.mxu1 %v1073_v5  ;;  %597 = vmatpush.msrb.mxu0 %v1130_v27  ;;  %v1236_v5 = vand.u32 4294901760, %v435_v2  ;;  %v526_v8 = vand.u32 4294901760, %v1234_v4 }
  0x34   : > { %412 = vmatpush.msra.mxu1 %v1078_v7  ;;  %600 = vmatpush.msrb.mxu0 %v1133_v28  ;;  %v521_v7 = vsub.f32 %v1223_v0, %v520_v3  ;;  %v1249_v9 = vsub.f32 %v435_v2, %v1236_v5  ;;  %v527_v13 = vsub.f32 %v1234_v4, %v526_v8  ;;  %v558_v2 = vand.u32 4294901760, %v557_v58 }
  0x35   : > { %389 = vmatmul.f32.vlgmr.msra.gmra.mxu0 %v1145_v33  ;;  %414 = vmatmul.f32.vlgmr.msra.gmra.mxu1 %v1145_v33  ;;  %v539_v33 = vsub.f32 %v1264_v16, %v538_v25 }
  0x36   : > { %644 = vmatpush.msrb.mxu1 %v1100_v14  ;;  %603 = vmatpush.msrb.mxu0 %v1175_v52  ;;  %v522_v12 = vand.u32 4294901760, %v521_v7  ;;  %v532_v15 = vand.u32 4294901760, %v1249_v9  ;;  %v528_v22 = vand.u32 4294901760, %v527_v13  ;;  %v568_v7 = vand.u32 4294901760, %v1338_v60 }
  0x37   : > { %462 = vmatpush.msra.mxu2 %v1236_v5  ;;  %v540_v41 = vand.u32 4294901760, %v539_v33  ;;  %v564_v13 = vand.u32 4294901760, %v563_v6 }
  0x38   : > { %646 = vmatpush.msrb.mxu1 %v1108_v17  ;;  %606 = vmatpush.msrb.mxu0 %v1223_v0  ;;  %v533_v24 = vsub.f32 %v1249_v9, %v532_v15  ;;  %v569_v21 = vsub.f32 %v1338_v60, %v568_v7 }
  0x39   : > { %464 = vmatpush.msra.mxu2 %v1251_v10  ;;  %523 = vmatpush.msra.mxu3 %v522_v12  ;;  %v573_v12 = vsub.f32 %v428_v56, %v1341_v61 }
  0x3a   : > { %648 = vmatpush.msrb.mxu1 %v1110_v18  ;;  %609 = vmatpush.msrb.mxu0 %v1234_v4  ;;  %v534_v32 = vand.u32 4294901760, %v533_v24  ;;  %v570_v31 = vand.u32 4294901760, %v569_v21 }
  0x3b   : > { %466 = vmatpush.msra.mxu2 %v1268_v20  ;;  %529 = vmatpush.msra.mxu3 %v528_v22  ;;  %v579_v22 = vsub.f32 %v427_v63, %v1349_v11  ;;  %v574_v24 = vand.u32 4294901760, %v573_v12 }
  0x3c   : > { %650 = vmatpush.msrb.mxu1 %v1112_v19  ;;  %612 = vmatpush.msrb.mxu0 %v1249_v9 }
  0x3d   : > { %468 = vmatpush.msra.mxu2 %v1278_v29  ;;  %535 = vmatpush.msra.mxu3 %v534_v32  ;;  %v580_v32 = vand.u32 4294901760, %v579_v22  ;;  %v575_v33 = vsub.f32 %v573_v12, %v574_v24 }
  0x3e   : > { %652 = vmatpush.msrb.mxu1 %v1167_v46  ;;  %615 = vmatpush.msrb.mxu0 %v1264_v16 }
  0x3f   : > { %470 = vmatpush.msra.mxu2 %v1295_v37  ;;  %541 = vmatpush.msra.mxu3 %v540_v41  ;;  %v581_v39 = vsub.f32 %v579_v22, %v580_v32  ;;  %v576_v41 = vand.u32 4294901760, %v575_v33 }
  0x40   : > { %654 = vmatpush.msrb.mxu1 %v1217_v62  ;;  %618 = vmatpush.msrb.mxu0 %v1282_v30 }
  0x41   : > { %472 = vmatpush.msra.mxu2 %v1307_v44  ;;  %547 = vmatpush.msra.mxu3 %v546_v54  ;;  %v582_v47 = vand.u32 4294901760, %v581_v39 }
  0x42   : > { %656 = vmatpush.msrb.mxu1 %v1225_v1  ;;  %621 = vmatpush.msrb.mxu0 %v1293_v36 }
  0x43   : > { %474 = vmatpush.msra.mxu2 %v1325_v53  ;;  %553 = vmatpush.msra.mxu3 %v552_v57 }
  0x44   : > { %658 = vmatpush.msrb.mxu1 %v1236_v5  ;;  %624 = vmatpush.msrb.mxu0 %v1305_v43 }
  0x45   : > { %476 = vmatpush.msra.mxu2 %v1341_v61  ;;  %559 = vmatpush.msra.mxu3 %v558_v2 }
  0x46   : > { %660 = vmatpush.msrb.mxu1 %v1251_v10  ;;  %627 = vmatpush.msrb.mxu0 %v1323_v51 }
  0x47   : > { %478 = vmatpush.msra.mxu2 %v1349_v11  ;;  %565 = vmatpush.msra.mxu3 %v564_v13 }
  0x48   : > { %662 = vmatpush.msrb.mxu1 %v1268_v20  ;;  %630 = vmatpush.msrb.mxu0 %v1338_v60 }
  0x49   : > { %685 = vmatpush.msrb.mxu2 %v490_v34  ;;  %571 = vmatpush.msra.mxu3 %v570_v31 }
  0x4a   : > { %664 = vmatpush.msrb.mxu1 %v1278_v29  ;;  %633 = vmatpush.msrb.mxu0 %v573_v12 }
  0x4b   : > { %689 = vmatpush.msrb.mxu2 %v496_v35  ;;  %577 = vmatpush.msra.mxu3 %v576_v41 }
  0x4c   : > { %666 = vmatpush.msrb.mxu1 %v1295_v37  ;;  %636 = vmatpush.msrb.mxu0 %v579_v22 }
  0x4d   : > { %693 = vmatpush.msrb.mxu2 %v502_v40  ;;  %583 = vmatpush.msra.mxu3 %v582_v47 }
  0x4e   : > { %668 = vmatpush.msrb.mxu1 %v1307_v44 }
  0x4f   : > { %697 = vmatpush.msrb.mxu2 %v508_v45  ;;  %752 = vmatpush.msrb.mxu3 %v1100_v14 }
  0x50   : > { %670 = vmatpush.msrb.mxu1 %v1325_v53 }
  0x51   : > { %701 = vmatpush.msrb.mxu2 %v514_v55  ;;  %754 = vmatpush.msrb.mxu3 %v1108_v17 }
  0x52   : > { %672 = vmatpush.msrb.mxu1 %v1341_v61 }
  0x53   : > { %705 = vmatpush.msrb.mxu2 %v520_v3  ;;  %756 = vmatpush.msrb.mxu3 %v1110_v18  ;;  %v913_v18 = vld [vmem:[%s1442_s2] ss:$0 sm:$0xff] }
  0x54   : > { %674 = vmatpush.msrb.mxu1 %v1349_v11 }
  0x55   : > { %709 = vmatpush.msrb.mxu2 %v526_v8  ;;  %758 = vmatpush.msrb.mxu3 %v1112_v19 }
  0x57   : > { %713 = vmatpush.msrb.mxu2 %v532_v15  ;;  %760 = vmatpush.msrb.mxu3 %v1167_v46 }
  0x59   : > { %717 = vmatpush.msrb.mxu2 %v538_v25  ;;  %762 = vmatpush.msrb.mxu3 %v1217_v62  ;;  %v914_v25 = vld [vmem:[%s1444_s4] ss:$0 sm:$0xff] }
  0x5b   : > { %721 = vmatpush.msrb.mxu2 %v544_v38  ;;  %764 = vmatpush.msrb.mxu3 %v1225_v1 }
  0x5d   : > { %725 = vmatpush.msrb.mxu2 %v550_v42  ;;  %766 = vmatpush.msrb.mxu3 %v1236_v5 }
  0x5f   : > { %729 = vmatpush.msrb.mxu2 %v556_v50  ;;  %768 = vmatpush.msrb.mxu3 %v1251_v10 }
  0x61   : > { %733 = vmatpush.msrb.mxu2 %v562_v59  ;;  %770 = vmatpush.msrb.mxu3 %v1268_v20 }
  0x63   : > { %737 = vmatpush.msrb.mxu2 %v568_v7  ;;  %772 = vmatpush.msrb.mxu3 %v1278_v29 }
  0x65   : > { %741 = vmatpush.msrb.mxu2 %v574_v24  ;;  %774 = vmatpush.msrb.mxu3 %v1295_v37 }
  0x67   : > { %745 = vmatpush.msrb.mxu2 %v580_v32  ;;  %776 = vmatpush.msrb.mxu3 %v1307_v44 }
  0x69   : > { %778 = vmatpush.msrb.mxu3 %v1325_v53 }
  0x6b   : > { %780 = vmatpush.msrb.mxu3 %v1341_v61 }
  0x6d   : > { %782 = vmatpush.msrb.mxu3 %v1349_v11 }
  0xa2   : > { %v259_v14 = vpop.f32.mrf.mxu0  ;;  %v300_v17 = vpop.f32.mrf.mxu1 }
  0xa3   : > { %v260_v19 = vadd.f32 %v913_v18, %v259_v14 }
  0xa5   : > { %v301_v27 = vadd.f32 %v300_v17, %v260_v19 }
  0xaa   : > { %v330_v23 = vpop.f32.mrf.mxu0  ;;  %v357_v26 = vpop.f32.mrf.mxu1 }
  0xab   : > { %v331_v28 = vadd.f32 %v330_v23, %v301_v27 }
  0xad   : > { %v358_v34 = vadd.f32 %v357_v26, %v331_v28 }
  0xb2   : > { %v390_v35 = vpop.f32.mrf.mxu0  ;;  %v415_v40 = vpop.f32.mrf.mxu1 }
  0xb3   : > { %v391_v45 = vadd.f32 %v390_v35, %v358_v34 }
  0xb5   : > { %v416_v46 = vadd.f32 %v415_v40, %v391_v45 }
  0xb7   : > { %v419_v52 = vmul.f32 %v416_v46, %v416_v46  ;;  %v418_v4 = vmul.f32 0.5, %v416_v46 }
  0xb9   : > { %v420_v55 = vmul.f32 %v419_v52, %v416_v46 }
  0xbb   : > { %v421_v62 = vmul.f32 0.44715, %v420_v55 }
  0xbd   : > { %v422_v0 = vadd.f32 %v421_v62, %v416_v46 }
  0xbf   : > { %v423_v1 = vmul.f32 0.7978846, %v422_v0 }
  0xc1   : > { %915 = vtanh.f32 %v423_v1 }
  0xc7   : > { %v916_v3 = vpop.eup %915 }
  0xc8   : > { %v425_v5 = vadd.f32 1.0, %v916_v3 }
  0xca   : > { %v426_v8 = vmul.f32 %v425_v5, %v418_v4 }
  0xcc   : > { %v479_v9 = vand.u32 4294901760, %v426_v8 }
  0xce   : > { %585 = vmatmul.f32.vlgmr.msra.gmra.mxu3 %v479_v9  ;;  %v480_v10 = vsub.f32 %v426_v8, %v479_v9 }
  0xd0   : > { %639 = vmatmul.f32.vlgmr.msrb.gmra.mxu0 %v480_v10  ;;  %v481_v15 = vand.u32 4294901760, %v480_v10 }
  0xd2   : > { %678 = vmatmul.f32.vlgmr.msrb.gmra.mxu1 %v481_v15  ;;  %v482_v16 = vsub.f32 %v480_v10, %v481_v15 }
  0xd4   : > { %v483_v20 = vand.u32 4294901760, %v482_v16 }
  0xd6   : > { %484 = vmatmul.f32.vlgmr.msra.gmra.mxu2 %v483_v20  ;;  %784 = vmatmul.f32.vlgmr.msrb.gmra.mxu3 %v479_v9 }
  0xde   : > { %747 = vmatmul.f32.vlgmr.msrb.gmra.mxu2 %v479_v9 }
 0x14d   : > { %v640_v38 = vpop.f32.mrf.mxu0 }
 0x14f   : > { %v679_v43 = vpop.f32.mrf.mxu1 }
 0x151   : > { %v586_v29 = vpop.f32.mrf.mxu3 }
 0x159   : > { %v485_v30 = vpop.f32.mrf.mxu2  ;;  %v785_v50 = vpop.f32.mrf.mxu3 }
 0x15a   : > { %v486_v36 = vadd.f32 %v914_v25, %v485_v30 }
 0x15c   : > { %v587_v37 = vadd.f32 %v586_v29, %v486_v36 }
 0x15e   : > { %v641_v42 = vadd.f32 %v640_v38, %v587_v37 }
 0x160   : > { %v680_v44 = vadd.f32 %v679_v43, %v641_v42 }
 0x161   : > { %v748_v48 = vpop.f32.mrf.mxu2 }
 0x162   : > { %v749_v49 = vadd.f32 %v748_v48, %v680_v44 }
 0x164   : > { %v786_v51 = vadd.f32 %v785_v50, %v749_v49 }
 0x166   : > { %788 = vst.msk [vmem:[%s215_s12] sm:$0xff] %vm229_vm0, %v786_v51 }
 0x167   : > { %944 = shalt.err (!%p941_p3)
}
 0x168   : > { %874 = dma.vmem_to_hbm [thread:$0]  (%p1049_p5), %s803_s13, 128, %s805_s14, %s790_s22  }
 0x169 PF: > { %p880_p4 = scmp.ge.s32.totalorder %s979_s21, 2  ;;  %s816_s6 = sand.u32 1, %s967_s18  }
 0x16a   : > { %s817_s7 = scalar_lea.sflag [#allocation3], %s816_s6 }
 0x16b   : > { %p877_p7 = pnand %p880_p4, %p1053_p6 }
 0x16d   : > { %p878_p8 = pneg %p877_p7 }
 0x16f   : > { %962 = dma.done.wait (%p878_p8), %s817_s7, 128  }
 0x170   : > { %964 = vsyncadd (%p878_p8), %s817_s7, 4294967168  ;;  %p15_p9 = scmp.ge.s32.totalorder %s1036_s24, 4   ;;  %s1448_s18 = smov %s971_s19 }
 0x171   : > { %s1449_s19 = smov %s975_s20  ;;  %s1450_s20 = smov %s1047_s27 }
 0x172   : > { %s1451_s21 = smov %s1036_s24  ;;  %17 = sbr.rel (!%p15_p9) target bundleno = 3 (0x3), region = 75 }
 0x177   :  { %823 = vsyncpa [#allocation3], 1 }
 0x178   :  { %825 = vsyncpa [#allocation3 + $0x1], 1 }

</bundles_post_ra>
